<compile_context>
chip_gen: v7x
topology: tpu7x:2x2x1
jax: 0.10.0
libtpu: 0.0.40
codegen_flags: <defaults>
</compile_context>

<pallas_src>
import functools
import math

import jax
import jax.numpy as jnp
from jax.experimental import pallas as pl
from jax.experimental.pallas import tpu as pltpu

_INT32_MAX = jnp.iinfo(jnp.int32).max


def _argmax_rows_kernel(x_ref, max_ref, arg_ref, max_sc, argc_sc, chunk_sc, *, vsub):
    """Running per-row max / argmax over vocab chunks of the sublane-dense rows."""
    j = pl.program_id(1)

    @pl.when(j == 0)
    def _init():
        max_sc[...] = jnp.full_like(max_sc, -jnp.inf)
        argc_sc[...] = jnp.zeros_like(argc_sc)
        chunk_sc[...] = jnp.zeros_like(chunk_sc)

    # torch does m_logits.float() before topk -> all comparison math in f32.
    x = x_ref[...].astype(jnp.float32)                      # (bm, bc)
    bm, bc = x.shape
    col = jax.lax.broadcasted_iota(jnp.int32, (bm, bc), 1)

    # Mask the padded columns of a ragged final chunk (trace-time skipped when
    # the chunk width divides the row length, e.g. the whole-vocab block case).
    if vsub % bc != 0:
        x = jnp.where(col + j * bc < vsub, x, -jnp.inf)

    # Chunk-local max and FIRST column attaining it (first-occurrence ties).
    local_max = jnp.max(x, axis=-1, keepdims=True)           # (bm, 1)
    local_arg = jnp.min(
        jnp.where(x == local_max, col, _INT32_MAX), axis=-1, keepdims=True)

    # Strict '>' keeps the earlier chunk on ties -> global first occurrence.
    better = local_max > max_sc[...]
    max_sc[...] = jnp.where(better, local_max, max_sc[...])
    argc_sc[...] = jnp.where(better, local_arg, argc_sc[...])
    chunk_sc[...] = jnp.where(better, j, chunk_sc[...])

    @pl.when(j == pl.num_programs(1) - 1)
    def _finalize():
        max_ref[...] = max_sc[...]
        arg_ref[...] = chunk_sc[...] * bc + argc_sc[...]


def _num_tensorcores():
    """Best-effort TensorCore count (v7x=2); falls back to 1 on any doubt."""
    try:
        n = getattr(jax.devices()[0], "num_cores", None)
        return int(n) if n else 1
    except Exception:
        return 1


def greedy_head(m_logits, *, max_block_elems=512 * 1024):
    """Pallas equivalent of GreedyHead.forward: per-row argmax of the logits,
    returned with a trailing singleton dim (like torch.topk(..., 1) indices)."""
    orig_shape = m_logits.shape
    vocab = orig_shape[-1]
    batch = math.prod(orig_shape[:-1])
    x2d = m_logits.reshape(batch, vocab)

    # Sublane-dense fold: (B, V) -> (B*SUB, V/SUB) is a free row-major view
    # that fills the vreg sublanes instead of leaving them 75-87% padding.
    sub = 1
    for s in (16, 8, 4, 2):
        if vocab % s == 0:
            sub = s
            break
    vsub = vocab // sub
    rows = batch * sub
    xr = x2d.reshape(rows, vsub)

    # Block selection: a single whole-array block for decode-sized inputs
    # (one grid step), otherwise large lane-aligned chunks + tail masking.
    if rows * vsub <= max_block_elems:
        row_block, col_block = rows, vsub
    else:
        row_block = rows if rows <= 256 else 256
        col_block = max(128, (max_block_elems // row_block) // 128 * 128)
        if col_block >= vsub:
            col_block = vsub
    grid_rows = pl.cdiv(rows, row_block)
    grid_cols = pl.cdiv(vsub, col_block)

    # v7x: give the second TensorCore half the rows when there would otherwise
    # be a single "parallel" block.  No-op on single-core v5e/v6e.
    if grid_rows == 1 and row_block % 16 == 0 and _num_tensorcores() >= 2:
        row_block //= 2
        grid_rows = 2

    kernel = functools.partial(_argmax_rows_kernel, vsub=vsub)
    rowmax, rowarg = pl.pallas_call(
        kernel,
        out_shape=(jax.ShapeDtypeStruct((rows, 1), jnp.float32),
                   jax.ShapeDtypeStruct((rows, 1), jnp.int32)),
        grid_spec=pltpu.PrefetchScalarGridSpec(
            num_scalar_prefetch=0,
            grid=(grid_rows, grid_cols),
            in_specs=[pl.BlockSpec((row_block, col_block), lambda i, j: (i, j))],
            out_specs=[pl.BlockSpec((row_block, 1), lambda i, j: (i, 0)),
                       pl.BlockSpec((row_block, 1), lambda i, j: (i, 0))],
            scratch_shapes=[pltpu.VMEM((row_block, 1), jnp.float32),   # running max
                            pltpu.VMEM((row_block, 1), jnp.int32),     # local argmax
                            pltpu.VMEM((row_block, 1), jnp.int32)],    # winning chunk
        ),
        compiler_params=pltpu.CompilerParams(
            dimension_semantics=("parallel", "arbitrary"),
            vmem_limit_bytes=32 * 1024 * 1024,
        ),
        cost_estimate=pl.CostEstimate(
            flops=rows * vsub,
            transcendentals=0,
            bytes_accessed=rows * vsub * x2d.dtype.itemsize + rows * 8,
        ),
    )(xr)

    # Tiny JAX epilogue: combine the SUB partial (max, arg) pairs per original
    # row.  jnp.argmax picks the lowest sublane on ties, which (with the lowest
    # column already chosen in-kernel) preserves first-occurrence semantics.
    rm = rowmax.reshape(batch, sub)
    ra = rowarg.reshape(batch, sub)
    best_s = jnp.argmax(rm, axis=-1)                                   # (batch,)
    best_c = jnp.take_along_axis(ra, best_s[:, None], axis=-1)[:, 0]   # (batch,)
    token = (best_s * vsub + best_c).astype(jnp.int32)[:, None]        # (batch,1)
    # TODO(synk): torch returns int64 indices; int32 is TPU-native and safe for vocab < 2**31.
    return token.reshape(orig_shape[:-1] + (1,))


if __name__ == "__main__":
    key = jax.random.PRNGKey(0)

    # 1) Decode-like: 2 rows of bf16 logits (kernel casts to f32 like torch .float()).
    B, V = 2, 8192
    m_logits = jax.random.normal(key, (B, V), jnp.float32).astype(jnp.bfloat16)
    token = greedy_head(m_logits)
    jax.block_until_ready(token)
    ref = jnp.argmax(m_logits.astype(jnp.float32), axis=-1)[..., None].astype(jnp.int32)
    assert token.shape == (B, 1) and token.dtype == jnp.int32
    assert bool(jnp.array_equal(token, ref)), (token, ref)

    # 2) The (1, 1, vocab) layout used by the Qwen decode demo.
    m3 = jax.random.normal(jax.random.fold_in(key, 1), (1, 1, V), jnp.float32)
    t3 = greedy_head(m3)
    jax.block_until_ready(t3)
    ref3 = jnp.argmax(m3, axis=-1)[..., None].astype(jnp.int32)
    assert t3.shape == (1, 1, 1) and bool(jnp.array_equal(t3, ref3)), (t3, ref3)

    # 3) Non-power-of-two vocab with forced chunking + ragged-tail masking.
    B4, V4 = 2, 4000      # sub=16 -> vsub=250 -> 2 chunks of 128 with masked tail
    m4 = jax.random.normal(jax.random.fold_in(key, 2), (B4, V4), jnp.float32)
    t4 = greedy_head(m4, max_block_elems=4096)
    jax.block_until_ready(t4)
    ref4 = jnp.argmax(m4, axis=-1)[..., None].astype(jnp.int32)
    assert t4.shape == (B4, 1) and bool(jnp.array_equal(t4, ref4)), (t4, ref4)

    print("KERNEL_OK")
</pallas_src>

<mosaic_0001>
module attributes {stable_mosaic.version = 11 : i64} {
  func.func @_argmax_rows_kernel(%arg0: i32, %arg1: i32, %arg2: memref<32x512xbf16, #tpu.memory_space<vmem>>, %arg3: memref<32x1xf32, #tpu.memory_space<vmem>>, %arg4: memref<32x1xi32, #tpu.memory_space<vmem>>, %arg5: memref<32x1xf32, #tpu.memory_space<vmem>>, %arg6: memref<32x1xi32, #tpu.memory_space<vmem>>, %arg7: memref<32x1xi32, #tpu.memory_space<vmem>>) attributes {dimension_semantics = [#tpu.dimension_semantics<parallel>, #tpu.dimension_semantics<arbitrary>], iteration_bounds = array<i64: 1, 1>, scalar_prefetch = 0 : i64, scratch_operands = 3 : i64, tpu.core_type = #tpu.core_type<tc>, window_params = [{transform_indices = @transform_0, window_bounds = array<i64: 32, 512>}, {transform_indices = @transform_1, window_bounds = array<i64: 32, 1>}, {transform_indices = @transform_2, window_bounds = array<i64: 32, 1>}]} {
    %c0_i32 = arith.constant 0 : i32
    %0 = arith.cmpi eq, %arg1, %c0_i32 : i32
    %1 = arith.extui %0 : i1 to i32
    %c0_i32_0 = arith.constant 0 : i32
    %2 = arith.cmpi ne, %1, %c0_i32_0 : i32
    scf.if %2 {
      %cst_19 = arith.constant 0xFF800000 : f32
      %29 = vector.broadcast %cst_19 : f32 to vector<32x1xf32>
      %c0_20 = arith.constant 0 : index
      %c0_21 = arith.constant 0 : index
      %30 = vector.load %arg5[%c0_20, %c0_21] : memref<32x1xf32, #tpu.memory_space<vmem>>, vector<32x1xf32>
      tpu.vector_store %arg5[%c0_20, %c0_21], %29 {strides = array<i32>} : memref<32x1xf32, #tpu.memory_space<vmem>>, vector<32x1xf32>,
      %c0_i32_22 = arith.constant 0 : i32
      %31 = vector.broadcast %c0_i32_22 : i32 to vector<32x1xi32>
      %c0_23 = arith.constant 0 : index
      %c0_24 = arith.constant 0 : index
      %32 = vector.load %arg6[%c0_23, %c0_24] : memref<32x1xi32, #tpu.memory_space<vmem>>, vector<32x1xi32>
      tpu.vector_store %arg6[%c0_23, %c0_24], %31 {strides = array<i32>} : memref<32x1xi32, #tpu.memory_space<vmem>>, vector<32x1xi32>,
      %c0_i32_25 = arith.constant 0 : i32
      %33 = vector.broadcast %c0_i32_25 : i32 to vector<32x1xi32>
      %c0_26 = arith.constant 0 : index
      %c0_27 = arith.constant 0 : index
      %34 = vector.load %arg7[%c0_26, %c0_27] : memref<32x1xi32, #tpu.memory_space<vmem>>, vector<32x1xi32>
      tpu.vector_store %arg7[%c0_26, %c0_27], %33 {strides = array<i32>} : memref<32x1xi32, #tpu.memory_space<vmem>>, vector<32x1xi32>,
    } else {
    }
    %c0 = arith.constant 0 : index
    %c0_1 = arith.constant 0 : index
    %3 = vector.load %arg2[%c0, %c0_1] : memref<32x512xbf16, #tpu.memory_space<vmem>>, vector<32x512xbf16>
    %4 = arith.extf %3 : vector<32x512xbf16> to vector<32x512xf32>
    %5 = tpu.iota {dimensions = array<i32: 1>} : vector<32x512xi32>
    %cst = arith.constant dense<0xFF800000> : vector<32xf32>
    %6 = vector.multi_reduction <maximumf>, %4, %cst [1] : vector<32x512xf32> to vector<32xf32>
    %7 = vector.shape_cast %6 : vector<32xf32> to vector<32x1xf32>
    %8 = vector.broadcast %7 : vector<32x1xf32> to vector<32x512xf32>
    %9 = arith.cmpf oeq, %4, %8 : vector<32x512xf32>
    %c2147483647_i32 = arith.constant 2147483647 : i32
    %10 = vector.broadcast %c2147483647_i32 : i32 to vector<32x512xi32>
    %11 = arith.select %9, %5, %10 : vector<32x512xi1>, vector<32x512xi32>
    %cst_2 = arith.constant dense<2147483647> : vector<32xi32>
    %12 = vector.multi_reduction <minsi>, %11, %cst_2 [1] : vector<32x512xi32> to vector<32xi32>
    %13 = vector.shape_cast %12 : vector<32xi32> to vector<32x1xi32>
    %c0_3 = arith.constant 0 : index
    %c0_4 = arith.constant 0 : index
    %14 = vector.load %arg5[%c0_3, %c0_4] : memref<32x1xf32, #tpu.memory_space<vmem>>, vector<32x1xf32>
    %15 = arith.cmpf ogt, %7, %14 : vector<32x1xf32>
    %c0_5 = arith.constant 0 : index
    %c0_6 = arith.constant 0 : index
    %16 = vector.load %arg5[%c0_5, %c0_6] : memref<32x1xf32, #tpu.memory_space<vmem>>, vector<32x1xf32>
    %17 = arith.select %15, %7, %16 : vector<32x1xi1>, vector<32x1xf32>
    %c0_7 = arith.constant 0 : index
    %c0_8 = arith.constant 0 : index
    %18 = vector.load %arg5[%c0_7, %c0_8] : memref<32x1xf32, #tpu.memory_space<vmem>>, vector<32x1xf32>
    tpu.vector_store %arg5[%c0_7, %c0_8], %17 {strides = array<i32>} : memref<32x1xf32, #tpu.memory_space<vmem>>, vector<32x1xf32>,
    %c0_9 = arith.constant 0 : index
    %c0_10 = arith.constant 0 : index
    %19 = vector.load %arg6[%c0_9, %c0_10] : memref<32x1xi32, #tpu.memory_space<vmem>>, vector<32x1xi32>
    %20 = arith.select %15, %13, %19 : vector<32x1xi1>, vector<32x1xi32>
    %c0_11 = arith.constant 0 : index
    %c0_12 = arith.constant 0 : index
    %21 = vector.load %arg6[%c0_11, %c0_12] : memref<32x1xi32, #tpu.memory_space<vmem>>, vector<32x1xi32>
    tpu.vector_store %arg6[%c0_11, %c0_12], %20 {strides = array<i32>} : memref<32x1xi32, #tpu.memory_space<vmem>>, vector<32x1xi32>,
    %c0_13 = arith.constant 0 : index
    %c0_14 = arith.constant 0 : index
    %22 = vector.load %arg7[%c0_13, %c0_14] : memref<32x1xi32, #tpu.memory_space<vmem>>, vector<32x1xi32>
    %23 = vector.broadcast %arg1 : i32 to vector<32x1xi32>
    %24 = arith.select %15, %23, %22 : vector<32x1xi1>, vector<32x1xi32>
    %c0_15 = arith.constant 0 : index
    %c0_16 = arith.constant 0 : index
    %25 = vector.load %arg7[%c0_15, %c0_16] : memref<32x1xi32, #tpu.memory_space<vmem>>, vector<32x1xi32>
    tpu.vector_store %arg7[%c0_15, %c0_16], %24 {strides = array<i32>} : memref<32x1xi32, #tpu.memory_space<vmem>>, vector<32x1xi32>,
    %c0_i32_17 = arith.constant 0 : i32
    %26 = arith.cmpi eq, %arg1, %c0_i32_17 : i32
    %27 = arith.extui %26 : i1 to i32
    %c0_i32_18 = arith.constant 0 : i32
    %28 = arith.cmpi ne, %27, %c0_i32_18 : i32
    scf.if %28 {
      %c0_19 = arith.constant 0 : index
      %c0_20 = arith.constant 0 : index
      %29 = vector.load %arg5[%c0_19, %c0_20] : memref<32x1xf32, #tpu.memory_space<vmem>>, vector<32x1xf32>
      %c0_21 = arith.constant 0 : index
      %c0_22 = arith.constant 0 : index
      %30 = vector.load %arg3[%c0_21, %c0_22] : memref<32x1xf32, #tpu.memory_space<vmem>>, vector<32x1xf32>
      tpu.vector_store %arg3[%c0_21, %c0_22], %29 {strides = array<i32>} : memref<32x1xf32, #tpu.memory_space<vmem>>, vector<32x1xf32>,
      %c0_23 = arith.constant 0 : index
      %c0_24 = arith.constant 0 : index
      %31 = vector.load %arg7[%c0_23, %c0_24] : memref<32x1xi32, #tpu.memory_space<vmem>>, vector<32x1xi32>
      %c512_i32 = arith.constant 512 : i32
      %32 = vector.broadcast %c512_i32 : i32 to vector<32x1xi32>
      %33 = arith.muli %31, %32 : vector<32x1xi32>
      %c0_25 = arith.constant 0 : index
      %c0_26 = arith.constant 0 : index
      %34 = vector.load %arg6[%c0_25, %c0_26] : memref<32x1xi32, #tpu.memory_space<vmem>>, vector<32x1xi32>
      %35 = arith.addi %33, %34 : vector<32x1xi32>
      %c0_27 = arith.constant 0 : index
      %c0_28 = arith.constant 0 : index
      %36 = vector.load %arg4[%c0_27, %c0_28] : memref<32x1xi32, #tpu.memory_space<vmem>>, vector<32x1xi32>
      tpu.vector_store %arg4[%c0_27, %c0_28], %35 {strides = array<i32>} : memref<32x1xi32, #tpu.memory_space<vmem>>, vector<32x1xi32>,
    } else {
    }
    return
  }
  func.func @transform_0(%arg0: i32, %arg1: i32) -> (i32, i32) {
    %c0_i32 = arith.constant 0 : i32
    return %arg0, %arg1 : i32, i32
  }
  func.func @transform_1(%arg0: i32, %arg1: i32) -> (i32, i32) {
    %c0_i32 = arith.constant 0 : i32
    %c0_i32_0 = arith.constant 0 : i32
    return %arg0, %c0_i32 : i32, i32
  }
  func.func @transform_2(%arg0: i32, %arg1: i32) -> (i32, i32) {
    %c0_i32 = arith.constant 0 : i32
    %c0_i32_0 = arith.constant 0 : i32
    return %arg0, %c0_i32 : i32, i32
  }
}

</mosaic_0001>

<bundles_post_ra>
// kernel: tpu_custom_call.1
= control target key start
LH: loop header
LB: loop body
LE: loop exit
PB: predicated region body
PF: predicated region fallthrough
CT: control target
= control target key end

     0   :  { %8 = vsyncpa [#allocation6], 0  ;;  %s313_s9 = smov [#allocation5]   ;;  %s573_s0 = inlined_call_operand.hbm [shape: bf16[32,512], index: 0, kind: input, shape index: {}]   ;;  %s574_s1 = inlined_call_operand.vmem [shape: f32[32,1], index: 1, kind: output, shape index: {0}]   ;;  %s575_s2 = inlined_call_operand.vmem [shape: s32[32,1], index: 2, kind: output, shape index: {1}]  }
   0x1   :  { %s14_s10 = sshll.u32 %s313_s9, 4  ;;  %s289_s13 = scalar_lea.hbm %s573_s0, 1024  ;;  %s15_s10 = int_to_ptr.vmem [resolvable:$true] %s14_s10 }
   0x2   :  { %p290_p0 = scmp.ne.s32.totalorder %s573_s0, %s289_s13  ;;  %p293_p1 = scmp.lt.u32.totalorder %s289_s13, %s573_s0 }
   0x4   :  { %p295_p2 = pnand %p293_p1, %p290_p0 }
   0x6   :  { %298 = shalt.err (!%p295_p2)
}
   0x7   :  { %s299_s18 = scalar_lea.vmem %s15_s10, 1024  ;;  %p304_p4 = scmp.lt.s32.totalorder %s15_s10, %s15_s10 }
   0x8   :  { %p300_p3 = scmp.ne.s32.totalorder %s15_s10, %s299_s18  ;;  %p305_p5 = scmp.lt.s32.totalorder %s299_s18, %s299_s18 }
   0xa   :  { %p306_p6 = por %p305_p5, %p304_p4 }
   0xc   :  { %p307_p7 = pnand %p306_p6, %p300_p3 }
   0xe   :  { %310 = shalt.err (!%p307_p7)
}
   0xf   :  { %s314_s19 = smov 256   ;;  %s315_s20 = smov 16  }
  0x10   :  { %20 = dma.hbm_to_vmem [thread:$0]  %s573_s0, 1024, %s15_s10, [#allocation6], %s314_s19, %s314_s19, %s315_s20  }
  0x11   :  { %311 = dma.done.wait [#allocation6], 1024  }
  0x12   :  { %312 = vsyncadd [#allocation6], 4294966272  ;;  %v345_v0 = vld [vmem:[#allocation5 + $0x20] sm:$0xff]  ;;  %v347_v1 = vld [vmem:[#allocation5 + $0x28] sm:$0xff]  ;;  %vm28_vm0 = vcmask 7168   ;;  %v316_v36 = vmov -inf   ;;  %v65_v38 = vlaneseq }
  0x13   :  { %v349_v2 = vld [vmem:[#allocation5] sm:$0xff]  ;;  %v57_v3 = vunpack.c.l.bf16 %v345_v0  ;;  %v58_v4 = vunpack.c.h.bf16 %v345_v0  ;;  %v59_v5 = vunpack.c.l.bf16 %v347_v1  ;;  %v354_v6 = vld [vmem:[#allocation5 + $0x8] sm:$0xff]  ;;  %v356_v7 = vld [vmem:[#allocation5 + $0x30] sm:$0xff]  ;;  %v60_v9 = vunpack.c.h.bf16 %v347_v1  ;;  %29 = vst.msk [vmem:[#allocation2] sm:$0xff] %vm28_vm0, %v316_v36 }
  0x14   :  { %v358_v8 = vld [vmem:[#allocation5 + $0x38] sm:$0xff]  ;;  %v49_v10 = vunpack.c.l.bf16 %v349_v2  ;;  %v50_v11 = vunpack.c.h.bf16 %v349_v2  ;;  %v51_v12 = vunpack.c.l.bf16 %v354_v6  ;;  %v364_v13 = vld [vmem:[#allocation5 + $0x10] sm:$0xff]  ;;  %v61_v16 = vunpack.c.l.bf16 %v356_v7  ;;  %30 = vst.msk [vmem:[#allocation2 + $0x8] sm:$0xff] %vm28_vm0, %v316_v36  ;;  %31 = vst.msk [vmem:[#allocation2 + $0x10] sm:$0xff] %vm28_vm0, %v316_v36 }
  0x15   :  { %v366_v14 = vld [vmem:[#allocation5 + $0x18] sm:$0xff]  ;;  %v80_v15 = vmax.f32 %v57_v3, %v58_v4  ;;  %v62_v17 = vunpack.c.h.bf16 %v356_v7  ;;  %v63_v18 = vunpack.c.l.bf16 %v358_v8  ;;  %v52_v19 = vunpack.c.h.bf16 %v354_v6  ;;  %32 = vst.msk [vmem:[#allocation2 + $0x18] sm:$0xff] %vm28_vm0, %v316_v36 }
  0x16   :  { %v70_v20 = vmax.f32 %v49_v10, %v50_v11  ;;  %v53_v21 = vunpack.c.l.bf16 %v364_v13  ;;  %v54_v22 = vunpack.c.h.bf16 %v364_v13  ;;  %v64_v24 = vunpack.c.h.bf16 %v358_v8 }
  0x17   :  { %v81_v23 = vmax.f32 %v80_v15, %v59_v5  ;;  %v85_v25 = vmax.f32 %v61_v16, %v62_v17  ;;  %v55_v26 = vunpack.c.l.bf16 %v366_v14  ;;  %v56_v28 = vunpack.c.h.bf16 %v366_v14 }
  0x18   :  { %v71_v27 = vmax.f32 %v70_v20, %v51_v12  ;;  %v75_v29 = vmax.f32 %v53_v21, %v54_v22  ;;  %v317_v37 = vmov 0   ;;  %v66_v39 = vand.u32 127, %v65_v38 }
  0x19   :  { %v82_v30 = vmax.f32 %v81_v23, %v60_v9  ;;  %v86_v31 = vmax.f32 %v85_v25, %v63_v18  ;;  %33 = vst.msk [vmem:[#allocation3] sm:$0xff] %vm28_vm0, %v317_v37  ;;  %37 = vst.msk [vmem:[#allocation4] sm:$0xff] %vm28_vm0, %v317_v37 }
  0x1a   :  { %v72_v32 = vmax.f32 %v71_v27, %v52_v19  ;;  %v76_v33 = vmax.f32 %v75_v29, %v55_v26  ;;  %34 = vst.msk [vmem:[#allocation3 + $0x8] sm:$0xff] %vm28_vm0, %v317_v37  ;;  %35 = vst.msk [vmem:[#allocation3 + $0x10] sm:$0xff] %vm28_vm0, %v317_v37  ;;  %v67_v40 = vadd.s32 128, %v66_v39  ;;  %v68_v41 = vadd.s32 256, %v66_v39  ;;  %v416_v46 = vld [vmem:[#allocation2] sm:$0xff] }
  0x1b   :  { %83 = vmax.xlane.f32.xlu1 %v82_v30  ;;  %v87_v34 = vmax.f32 %v86_v31, %v64_v24  ;;  %36 = vst.msk [vmem:[#allocation3 + $0x18] sm:$0xff] %vm28_vm0, %v317_v37  ;;  %38 = vst.msk [vmem:[#allocation4 + $0x8] sm:$0xff] %vm28_vm0, %v317_v37  ;;  %v69_v44 = vadd.s32 384, %v66_v39  ;;  %v470_v14 = vld [vmem:[#allocation2 + $0x8] sm:$0xff] }
  0x1c   :  { %73 = vmax.xlane.f32.xlu0 %v72_v32  ;;  %v77_v35 = vmax.f32 %v76_v33, %v56_v28  ;;  %39 = vst.msk [vmem:[#allocation4 + $0x10] sm:$0xff] %vm28_vm0, %v317_v37  ;;  %40 = vst.msk [vmem:[#allocation4 + $0x18] sm:$0xff] %vm28_vm0, %v317_v37 }
  0x1f   :  { %88 = vmax.xlane.f32.xlu1 %v87_v34 }
  0x20   :  { %78 = vmax.xlane.f32.xlu0 %v77_v35  ;;  %v231_v7 = vld [vmem:[#allocation4] sm:$0xff] }
  0x22   :  { %v232_v20 = vld [vmem:[#allocation4 + $0x8] sm:$0xff] }
  0x23   :  { %v233_v25 = vld [vmem:[#allocation4 + $0x10] sm:$0xff] }
  0xa8   :  { %v405_v42 = vpop.xlane.xlu1 %83 }
  0xa9   :  { %v407_v43 = vpop.xlane.xlu0 %73  ;;  %vm98_vm1 = vcmp.eq.f32.partialorder %v57_v3, %v405_v42  ;;  %vm99_vm2 = vcmp.eq.f32.partialorder %v58_v4, %v405_v42  ;;  %vm412_vm3 = vcmp.eq.f32.partialorder %v59_v5, %v405_v42  ;;  %vm101_vm7 = vcmp.eq.f32.partialorder %v60_v9, %v405_v42 }
  0xaa   :  { %vm90_vm4 = vcmp.eq.f32.partialorder %v49_v10, %v407_v43  ;;  %vm91_vm5 = vcmp.eq.f32.partialorder %v50_v11, %v407_v43  ;;  %vm92_vm6 = vcmp.eq.f32.partialorder %v51_v12, %v407_v43  ;;  %vm423_vm8 = vcmp.eq.f32.partialorder %v52_v19, %v407_v43 }
  0xab   :  { %v106_v48 = vsel %vm90_vm4, %v66_v39, 2147483647  ;;  %v107_v49 = vsel %vm91_vm5, %v67_v40, 2147483647  ;;  %v108_v50 = vsel %vm92_vm6, %v68_v41, 2147483647  ;;  %vm206_vm10 = vcmp.gt.f32.partialorder %v407_v43, %v416_v46 }
  0xac   :  { %vm122_vm9 = vcmp.lt.s32.totalorder %v106_v48, %v107_v49  ;;  %v114_v51 = vsel %vm98_vm1, %v66_v39, 2147483647  ;;  %v115_v52 = vsel %vm99_vm2, %v67_v40, 2147483647  ;;  %v116_v55 = vsel %vm412_vm3, %v68_v41, 2147483647  ;;  %v439_v58 = vpop.xlane.xlu1 %88 }
  0xad   :  { %v429_v53 = vpop.xlane.xlu0 %78  ;;  %v123_v54 = vsel %vm122_vm9, %v106_v48, %v107_v49  ;;  %v117_v56 = vsel %vm101_vm7, %v69_v44, 2147483647  ;;  %vm162_vm11 = vcmp.lt.s32.totalorder %v114_v51, %v115_v52  ;;  %v109_v59 = vsel %vm423_vm8, %v69_v44, 2147483647 }
  0xae   :  { %vm124_vm12 = vcmp.lt.s32.totalorder %v123_v54, %v108_v50  ;;  %v163_v57 = vsel %vm162_vm11, %v114_v51, %v115_v52  ;;  %vm94_vm13 = vcmp.eq.f32.partialorder %v53_v21, %v429_v53  ;;  %vm95_vm14 = vcmp.eq.f32.partialorder %v54_v22, %v429_v53  ;;  %v478_v21 = vld [vmem:[#allocation2 + $0x10] sm:$0xff]  ;;  %v480_v22 = vld [vmem:[#allocation2 + $0x18] sm:$0xff] }
  0xaf   :  { %v125_v60 = vsel %vm124_vm12, %v123_v54, %v108_v50  ;;  %vm164_vm15 = vcmp.lt.s32.totalorder %v163_v57, %v116_v55  ;;  %vm96_vm1 = vcmp.eq.f32.partialorder %v55_v26, %v429_v53  ;;  %v110_v62 = vsel %vm94_vm13, %v66_v39, 2147483647 }
  0xb0   :  { %vm126_vm2 = vcmp.lt.s32.totalorder %v125_v60, %v109_v59  ;;  %v165_v61 = vsel %vm164_vm15, %v163_v57, %v116_v55  ;;  %v111_v63 = vsel %vm95_vm14, %v67_v40, 2147483647  ;;  %vm97_vm4 = vcmp.eq.f32.partialorder %v56_v28, %v429_v53  ;;  %v234_v28 = vld [vmem:[#allocation4 + $0x18] sm:$0xff] }
  0xb1   :  { %v446_v0 = vsel %vm126_vm2, %v125_v60, %v109_v59  ;;  %vm166_vm3 = vcmp.lt.s32.totalorder %v165_v61, %v117_v56  ;;  %v112_v1 = vsel %vm96_vm1, %v68_v41, 2147483647  ;;  %vm142_vm5 = vcmp.lt.s32.totalorder %v110_v62, %v111_v63 }
  0xb2   :  { %v129_v2 = vshra.s32 %v446_v0, 16  ;;  %v452_v3 = vsel %vm166_vm3, %v165_v61, %v117_v56  ;;  %vm102_vm6 = vcmp.eq.f32.partialorder %v61_v16, %v439_v58  ;;  %v143_v5 = vsel %vm142_vm5, %v110_v62, %v111_v63 }
  0xb3   :  { %v169_v4 = vshra.s32 %v452_v3, 16  ;;  %vm103_vm7 = vcmp.eq.f32.partialorder %v62_v17, %v439_v58  ;;  %vm104_vm8 = vcmp.eq.f32.partialorder %v63_v18, %v439_v58  ;;  %vm144_vm9 = vcmp.lt.s32.totalorder %v143_v5, %v112_v1 }
  0xb4   :  { %v464_v6 = vcvt.s32.f32 %v129_v2  ;;  %vm105_vm11 = vcmp.eq.f32.partialorder %v64_v24, %v439_v58  ;;  %v118_v9 = vsel %vm102_vm6, %v66_v39, 2147483647  ;;  %v113_v10 = vsel %vm97_vm4, %v69_v44, 2147483647 }
  0xb5   :  { %v145_v11 = vsel %vm144_vm9, %v143_v5, %v112_v1  ;;  %v119_v12 = vsel %vm103_vm7, %v67_v40, 2147483647  ;;  %v120_v13 = vsel %vm104_vm8, %v68_v41, 2147483647  ;;  %v121_v16 = vsel %vm105_vm11, %v69_v44, 2147483647 }
  0xb6   :  { %132 = vmin.xlane.f32.xlu0 %v464_v6  ;;  %vm146_vm12 = vcmp.lt.s32.totalorder %v145_v11, %v113_v10  ;;  %vm182_vm13 = vcmp.lt.s32.totalorder %v118_v9, %v119_v12  ;;  %v210_v8 = vsel %vm206_vm10, %v407_v43, %v416_v46  ;;  %v171_v18 = vcvt.s32.f32 %v169_v4 }
  0xb7   :  { %v147_v15 = vsel %vm146_vm12, %v145_v11, %v113_v10  ;;  %v183_v17 = vsel %vm182_vm13, %v118_v9, %v119_v12  ;;  %215 = vst.msk [vmem:[#allocation2] sm:$0xff] %vm28_vm0, %v210_v8  ;;  %v236_v24 = vsel %vm206_vm10, 0, %v231_v7  ;;  %vm207_vm15 = vcmp.gt.f32.partialorder %v429_v53, %v470_v14  ;;  %v220_v8 = vld [vmem:[#allocation3 + $0x8] sm:$0xff] }
  0xb8   :  { %v149_v19 = vshra.s32 %v147_v15, 16  ;;  %vm184_vm14 = vcmp.lt.s32.totalorder %v183_v17, %v120_v13  ;;  %240 = vst.msk [vmem:[#allocation4] sm:$0xff] %vm28_vm0, %v236_v24  ;;  %v211_v27 = vsel %vm207_vm15, %v429_v53, %v470_v14  ;;  %v237_v30 = vsel %vm207_vm15, 0, %v232_v20 }
  0xb9   :  { %v185_v23 = vsel %vm184_vm14, %v183_v17, %v120_v13  ;;  %216 = vst.msk [vmem:[#allocation2 + $0x8] sm:$0xff] %vm28_vm0, %v211_v27  ;;  %vm208_vm2 = vcmp.gt.f32.partialorder %v405_v42, %v478_v21  ;;  %vm209_vm3 = vcmp.gt.f32.partialorder %v439_v58, %v480_v22  ;;  %241 = vst.msk [vmem:[#allocation4 + $0x8] sm:$0xff] %vm28_vm0, %v237_v30  ;;  %v128_v41 = vand.u32 65535, %v446_v0  ;;  %v221_v13 = vld [vmem:[#allocation3 + $0x10] sm:$0xff] }
  0xba   :  { %172 = vmin.xlane.f32.xlu0 %v171_v18  ;;  %v151_v26 = vcvt.s32.f32 %v149_v19  ;;  %vm186_vm1 = vcmp.lt.s32.totalorder %v185_v23, %v121_v16  ;;  %v212_v32 = vsel %vm208_vm2, %v405_v42, %v478_v21  ;;  %v238_v33 = vsel %vm208_vm2, 0, %v233_v25 }
  0xbb   :  { %v187_v29 = vsel %vm186_vm1, %v185_v23, %v121_v16  ;;  %217 = vst.msk [vmem:[#allocation2 + $0x10] sm:$0xff] %vm28_vm0, %v212_v32  ;;  %242 = vst.msk [vmem:[#allocation4 + $0x10] sm:$0xff] %vm28_vm0, %v238_v33  ;;  %v213_v34 = vsel %vm209_vm3, %v439_v58, %v480_v22  ;;  %v239_v35 = vsel %vm209_vm3, 0, %v234_v28  ;;  %v130_v45 = vcvt.s32.f32 %v128_v41 }
  0xbc   :  { %152 = vmin.xlane.f32.xlu1 %v151_v26  ;;  %v189_v31 = vshra.s32 %v187_v29, 16  ;;  %218 = vst.msk [vmem:[#allocation2 + $0x18] sm:$0xff] %vm28_vm0, %v213_v34  ;;  %243 = vst.msk [vmem:[#allocation4 + $0x18] sm:$0xff] %vm28_vm0, %v239_v35  ;;  %v168_v47 = vand.u32 65535, %v452_v3  ;;  %v148_v49 = vand.u32 65535, %v147_v15  ;;  %v188_v56 = vand.u32 65535, %v187_v29 }
  0xbd   :  { %v219_v3 = vld [vmem:[#allocation3] sm:$0xff] }
  0xbe   :  { %v191_v36 = vcvt.s32.f32 %v189_v31  ;;  %v247_v37 = vld [vmem:[#allocation2] sm:$0xff]  ;;  %v170_v51 = vcvt.s32.f32 %v168_v47  ;;  %v150_v54 = vcvt.s32.f32 %v148_v49  ;;  %v190_v60 = vcvt.s32.f32 %v188_v56 }
  0xbf   :  { %251 = vst.msk [vmem:[%s574_s1] sm:$0xff] %vm28_vm0, %v247_v37 }
  0xc0   :  { %192 = vmin.xlane.f32.xlu1 %v191_v36  ;;  %v248_v38 = vld [vmem:[#allocation2 + $0x8] sm:$0xff] }
  0xc1   :  { %252 = vst.msk [vmem:[%s574_s1 + $0x8] sm:$0xff] %vm28_vm0, %v248_v38  ;;  %v256_v31 = vld [vmem:[#allocation4 + $0x8] sm:$0xff] }
  0xc2   :  { %v249_v39 = vld [vmem:[#allocation2 + $0x10] sm:$0xff]  ;;  %v260_v21 = vmul.u32 512, %v256_v31 }
  0xc3   :  { %253 = vst.msk [vmem:[%s574_s1 + $0x10] sm:$0xff] %vm28_vm0, %v249_v39  ;;  %v250_v40 = vld [vmem:[#allocation2 + $0x18] sm:$0xff]  ;;  %v257_v28 = vld [vmem:[#allocation4 + $0x10] sm:$0xff] }
  0xc4   :  { %254 = vst.msk [vmem:[%s574_s1 + $0x18] sm:$0xff] %vm28_vm0, %v250_v40  ;;  %v261_v53 = vmul.u32 512, %v257_v28  ;;  %v258_v34 = vld [vmem:[#allocation4 + $0x18] sm:$0xff] }
  0xc5   :  { %v262_v58 = vmul.u32 512, %v258_v34 }
 0x143   :  { %v133_v44 = vpop.xlane.xlu0 %132 }
 0x144   :  { %vm134_vm4 = vcmp.eq.f32.partialorder %v464_v6, %v133_v44  ;;  %v139_v62 = vcvt.f32.s32 %v133_v44 }
 0x145   :  { %v135_v48 = vsel %vm134_vm4, %v130_v45, inf }
 0x146   :  { %136 = vmin.xlane.f32.xlu0 %v135_v48  ;;  %v140_v0 = vshll.u32 %v139_v62, 16 }
 0x147   :  { %v173_v50 = vpop.xlane.xlu0 %172 }
 0x148   :  { %vm174_vm5 = vcmp.eq.f32.partialorder %v171_v18, %v173_v50  ;;  %v179_v1 = vcvt.f32.s32 %v173_v50  ;;  %v255_v18 = vld [vmem:[#allocation4] sm:$0xff] }
 0x149   :  { %v153_v52 = vpop.xlane.xlu1 %152  ;;  %v175_v55 = vsel %vm174_vm5, %v170_v51, inf  ;;  %v259_v25 = vmul.u32 512, %v255_v18 }
 0x14a   :  { %vm154_vm6 = vcmp.eq.f32.partialorder %v151_v26, %v153_v52  ;;  %176 = vmin.xlane.f32.xlu0 %v175_v55  ;;  %v159_v4 = vcvt.f32.s32 %v153_v52  ;;  %v180_v9 = vshll.u32 %v179_v1, 16  ;;  %v222_v26 = vld [vmem:[#allocation3 + $0x18] sm:$0xff] }
 0x14b   :  { %v155_v57 = vsel %vm154_vm6, %v150_v54, inf }
 0x14c   :  { %156 = vmin.xlane.f32.xlu1 %v155_v57  ;;  %v160_v7 = vshll.u32 %v159_v4, 16 }
 0x14d   :  { %v193_v59 = vpop.xlane.xlu1 %192 }
 0x14e   :  { %vm194_vm7 = vcmp.eq.f32.partialorder %v191_v36, %v193_v59  ;;  %v199_v15 = vcvt.f32.s32 %v193_v59 }
 0x14f   :  { %v195_v61 = vsel %vm194_vm7, %v190_v60, inf }
 0x150   :  { %196 = vmin.xlane.f32.xlu1 %v195_v61  ;;  %v200_v46 = vshll.u32 %v199_v15, 16 }
 0x1d3   :  { %v137_v63 = vpop.xlane.xlu0 %136 }
 0x1d4   :  { %v138_v2 = vcvt.f32.s32 %v137_v63 }
 0x1d6   :  { %v141_v5 = vadd.s32 %v140_v0, %v138_v2 }
 0x1d7   :  { %v177_v6 = vpop.xlane.xlu0 %176 }
 0x1d8   :  { %v223_v10 = vsel %vm206_vm10, %v141_v5, %v219_v3  ;;  %v178_v11 = vcvt.f32.s32 %v177_v6 }
 0x1d9   :  { %227 = vst.msk [vmem:[#allocation3] sm:$0xff] %vm28_vm0, %v223_v10  ;;  %v157_v12 = vpop.xlane.xlu1 %156 }
 0x1da   :  { %v158_v16 = vcvt.f32.s32 %v157_v12  ;;  %v181_v17 = vadd.s32 %v180_v9, %v178_v11 }
 0x1dc   :  { %v161_v19 = vadd.s32 %v160_v7, %v158_v16  ;;  %v225_v20 = vsel %vm208_vm2, %v181_v17, %v221_v13 }
 0x1dd   :  { %229 = vst.msk [vmem:[#allocation3 + $0x10] sm:$0xff] %vm28_vm0, %v225_v20  ;;  %v197_v43 = vpop.xlane.xlu1 %196 }
 0x1de   :  { %v224_v23 = vsel %vm207_vm15, %v161_v19, %v220_v8  ;;  %v198_v24 = vcvt.f32.s32 %v197_v43 }
 0x1df   :  { %228 = vst.msk [vmem:[#allocation3 + $0x8] sm:$0xff] %vm28_vm0, %v224_v23 }
 0x1e0   :  { %v263_v27 = vld [vmem:[#allocation3] sm:$0xff]  ;;  %v201_v29 = vadd.s32 %v200_v46, %v198_v24 }
 0x1e1   :  { %v267_v30 = vadd.s32 %v263_v27, %v259_v25 }
 0x1e2   :  { %v226_v42 = vsel %vm209_vm3, %v201_v29, %v222_v26 }
 0x1e3   :  { %271 = vst.msk [vmem:[%s575_s2] sm:$0xff] %vm28_vm0, %v267_v30  ;;  %230 = vst.msk [vmem:[#allocation3 + $0x18] sm:$0xff] %vm28_vm0, %v226_v42 }
 0x1e4   :  { %v265_v14 = vld [vmem:[#allocation3 + $0x10] sm:$0xff] }
 0x1e5   :  { %v269_v32 = vadd.s32 %v265_v14, %v261_v53 }
 0x1e6   :  { %v264_v33 = vld [vmem:[#allocation3 + $0x8] sm:$0xff] }
 0x1e7   :  { %v268_v35 = vadd.s32 %v264_v33, %v260_v21  ;;  %273 = vst.msk [vmem:[%s575_s2 + $0x10] sm:$0xff] %vm28_vm0, %v269_v32 }
 0x1e9   :  { %272 = vst.msk [vmem:[%s575_s2 + $0x8] sm:$0xff] %vm28_vm0, %v268_v35 }
 0x1ea   :  { %v266_v22 = vld [vmem:[#allocation3 + $0x18] sm:$0xff] }
 0x1eb   :  { %v270_v36 = vadd.s32 %v266_v22, %v262_v58 }
 0x1ed   :  { %274 = vst.msk [vmem:[%s575_s2 + $0x18] sm:$0xff] %vm28_vm0, %v270_v36 }
 0x1ee   :  { %283 = vsyncpa [#allocation6], 1 }

</bundles_post_ra>
